<compile_context>
chip_gen: v5e
topology: v5e:2x2
jax: 0.10.0
libtpu: 0.0.40
codegen_flags: <defaults>
</compile_context>

<pallas_src>
import functools
import math

import numpy as np

import jax
import jax.numpy as jnp
from jax.experimental import pallas as pl
from jax.experimental.pallas import tpu as pltpu

D_MODEL = 64
MAX_LEN = 5000
LANES = 128
BLOCK_CAP_BYTES = 6 * 1024 * 1024   # per x/out block (double-buffered by Pallas)
VMEM_LIMIT_BYTES = 48 << 20         # explicit scoped-VMEM budget (safe on v5e..v7x)


def _build_pe_table_np(max_len, d_model):
    """Exactly mirrors the PyTorch __init__ (f32 table of shape (max_len, d_model))."""
    position = np.arange(max_len, dtype=np.float32)[:, None]
    div_term = np.exp(
        np.arange(0, d_model, 2, dtype=np.float32) * (-math.log(10000.0) / d_model)
    )
    pe = np.zeros((max_len, d_model), dtype=np.float32)
    pe[:, 0::2] = np.sin(position * div_term)
    pe[:, 1::2] = np.cos(position * div_term)
    return pe


# Built once at import, like the PyTorch registered buffer.
_PE_FULL = _build_pe_table_np(MAX_LEN, D_MODEL)


@functools.lru_cache(maxsize=None)
def _pe_view(s_pad, dtype_name):
    """Lane-dense (R, 128) device view of the PE table in the input dtype, cached."""
    r = (s_pad * D_MODEL) // LANES
    pe = _PE_FULL[:s_pad].reshape(r, LANES)
    return jnp.asarray(pe, dtype=jnp.dtype(dtype_name))


def _pe_add_kernel(pe_ref, x_ref, o_ref):
    # pe_ref: (R, 128), constant block index -> VMEM-resident across the grid.
    # x_ref / o_ref: (tb, R, 128) lane-dense tiles. Pure broadcast add (VPU).
    o_ref[...] = x_ref[...] + pe_ref[...][None, :, :]


def positional_encoding(x):
    """x: (B, S, D) with S <= MAX_LEN, D == 64. Returns x + pe[None, :S, :]."""
    B, S, D = x.shape
    assert D == D_MODEL and S <= MAX_LEN

    # Always take the lane-dense path: pad one sequence row when S is odd so
    # S*D is a multiple of 128 (one padded row costs ~0.02% extra traffic).
    s_pad = S + (S % 2)
    x_in = x if s_pad == S else jnp.pad(x, ((0, 0), (0, s_pad - S), (0, 0)))

    R = (s_pad * D) // LANES
    L = LANES
    x_v = x_in.reshape(B, R, L)
    pe_v = _pe_view(s_pad, jnp.dtype(x.dtype).name)

    # Batch tile: as many rows as fit in ~6 MiB per block; ragged last block
    # is handled by Pallas (grid = cdiv), no divisor search.
    row_bytes = R * L * x.dtype.itemsize
    tb_cap = max(1, BLOCK_CAP_BYTES // row_bytes)
    tb = min(B, tb_cap)
    if B >= 2:
        # Keep >= 2 grid steps along the "parallel" batch axis so v7x's two
        # TensorCores both get work.
        tb = max(1, min(tb, pl.cdiv(B, 2)))
    grid_b = pl.cdiv(B, tb)

    # Constant-index PE block: single pipeline buffer (no dead double buffer).
    try:
        pe_spec = pl.BlockSpec((R, L), lambda b: (0, 0), pipeline_mode=pl.Buffered(1))
    except TypeError:  # older BlockSpec without pipeline_mode kwarg
        pe_spec = pl.BlockSpec((R, L), lambda b: (0, 0))

    out = pl.pallas_call(
        _pe_add_kernel,
        out_shape=jax.ShapeDtypeStruct((B, R, L), x.dtype),
        grid=(grid_b,),
        in_specs=[
            pe_spec,
            pl.BlockSpec((tb, R, L), lambda b: (b, 0, 0)),
        ],
        out_specs=pl.BlockSpec((tb, R, L), lambda b: (b, 0, 0)),
        compiler_params=pltpu.CompilerParams(
            dimension_semantics=("parallel",),
            vmem_limit_bytes=VMEM_LIMIT_BYTES,
        ),
        # TODO(synk): callers that can donate x may add input_output_aliases={1: 0}
        # to drop the separate output allocation (HBM bytes moved are unchanged).
    )(pe_v, x_v)

    out = out.reshape(B, s_pad, D)
    if s_pad != S:
        out = out[:, :S, :]
    return out


def _reference(x):
    S = x.shape[1]
    return x + jnp.asarray(_PE_FULL[:S])[None, :, :].astype(x.dtype)


if __name__ == "__main__":
    key = jax.random.PRNGKey(0)
    B, S, D = 2, 8, D_MODEL
    x = jax.random.normal(key, (B, S, D), dtype=jnp.float32)

    out = positional_encoding(x)
    out = jax.block_until_ready(out)

    ref = _reference(x)
    assert out.shape == ref.shape
    assert jnp.allclose(out, ref, atol=1e-5, rtol=1e-5)
    print("KERNEL_OK")
</pallas_src>

<mosaic_0001>
module attributes {stable_mosaic.version = 11 : i64} {
  func.func @_pe_add_kernel(%arg0: i32, %arg1: memref<4x128xf32, #tpu.memory_space<vmem>>, %arg2: memref<1x4x128xf32, #tpu.memory_space<vmem>>, %arg3: memref<1x4x128xf32, #tpu.memory_space<vmem>>) attributes {dimension_semantics = [#tpu.dimension_semantics<parallel>], iteration_bounds = array<i64: 2>, scalar_prefetch = 0 : i64, scratch_operands = 0 : i64, tpu.core_type = #tpu.core_type<tc>, window_params = [{pipeline_mode = #tpu.pipeline_mode<synchronous>, transform_indices = @transform_0, window_bounds = array<i64: 4, 128>}, {transform_indices = @transform_1, window_bounds = array<i64: 1, 4, 128>}, {transform_indices = @transform_2, window_bounds = array<i64: 1, 4, 128>}]} {
    %c0 = arith.constant 0 : index
    %c0_0 = arith.constant 0 : index
    %c0_1 = arith.constant 0 : index
    %0 = vector.load %arg2[%c0, %c0_0, %c0_1] : memref<1x4x128xf32, #tpu.memory_space<vmem>>, vector<1x4x128xf32>
    %c0_2 = arith.constant 0 : index
    %c0_3 = arith.constant 0 : index
    %1 = vector.load %arg1[%c0_2, %c0_3] : memref<4x128xf32, #tpu.memory_space<vmem>>, vector<4x128xf32>
    %2 = vector.shape_cast %1 : vector<4x128xf32> to vector<1x4x128xf32>
    %3 = arith.addf %0, %2 : vector<1x4x128xf32>
    %c0_4 = arith.constant 0 : index
    %c0_5 = arith.constant 0 : index
    %c0_6 = arith.constant 0 : index
    %4 = vector.load %arg3[%c0_4, %c0_5, %c0_6] : memref<1x4x128xf32, #tpu.memory_space<vmem>>, vector<1x4x128xf32>
    tpu.vector_store %arg3[%c0_4, %c0_5, %c0_6], %3 {strides = array<i32>} : memref<1x4x128xf32, #tpu.memory_space<vmem>>, vector<1x4x128xf32>,
    return
  }
  func.func @transform_0(%arg0: i32) -> (i32, i32) {
    %c0_i32 = arith.constant 0 : i32
    %c0_i32_0 = arith.constant 0 : i32
    %c0_i32_1 = arith.constant 0 : i32
    return %c0_i32, %c0_i32_0 : i32, i32
  }
  func.func @transform_1(%arg0: i32) -> (i32, i32, i32) {
    %c0_i32 = arith.constant 0 : i32
    %c0_i32_0 = arith.constant 0 : i32
    %c0_i32_1 = arith.constant 0 : i32
    return %arg0, %c0_i32, %c0_i32_0 : i32, i32, i32
  }
  func.func @transform_2(%arg0: i32) -> (i32, i32, i32) {
    %c0_i32 = arith.constant 0 : i32
    %c0_i32_0 = arith.constant 0 : i32
    %c0_i32_1 = arith.constant 0 : i32
    return %arg0, %c0_i32, %c0_i32_0 : i32, i32, i32
  }
}

</mosaic_0001>

<bundles_post_ra>
// kernel: tpu_custom_call.1
= control target key start
LH: loop header
LB: loop body
LE: loop exit
PB: predicated region body
PF: predicated region fallthrough
CT: control target
= control target key end

     0   :  { %7 = vsyncpa [#allocation3], 0  ;;  %s635_s0 = inlined_call_operand.hbm [shape: f32[4,128], index: 0, kind: input, shape index: {}]   ;;  %s636_s1 = inlined_call_operand.hbm [shape: f32[2,4,128], index: 1, kind: input, shape index: {}]   ;;  %s637_s2 = inlined_call_operand.hbm [shape: f32[2,4,128], index: 2, kind: output, shape index: {}]  }
   0x1   :  { %8 = vsyncpa [#allocation6], 0 }
   0x2   :  { %10 = vsyncpa [#allocation6 + $0x1], 0 }
   0x3   :  { %11 = vsyncpa [#allocation4], 0 }
   0x4   :  { %13 = vsyncpa [#allocation4 + $0x1], 0  ;;  %s497_s9 = smov 0   ;;  %s499_s10 = smov 0  }
   0x5   :  { %s501_s11 = smov 0   ;;  %s503_s12 = smov 0  }
   0x6 LB: > { %s518_s13 = sadd.s32 4294967295, %s479_s12   ;;  %s278_s14 = sadd.s32 4294967294, %s479_s12   ;;  %s479_s12 = sphi %s503_s12, %s647_s12   ;;  %s475_s11 = sphi %s501_s11, %s646_s11   ;;  %s471_s10 = sphi %s499_s10, %s645_s10   ;;  %s467_s9 = sphi %s497_s9, %s644_s9  }
   0x7   : > { %p60_p0 = scmp.ne.s32.totalorder %s471_s10, %s467_s9  ;;  %p61_p1 = scmp.eq.s32.totalorder %s518_s13, 0 }
   0x8   : > { %p84_p2 = scmp.eq.s32.totalorder %s518_s13, 1  ;;  %p90_p3 = scmp.eq.s32.totalorder %s278_s14, 1 }
   0x9   : > { %p527_p4 = por %p61_p1, %p60_p0  ;;  %p279_p5 = scmp.ge.s32.totalorder %s479_s12, 1 }
   0xa   : > { %p532_p6 = por %p90_p3, %p60_p0  ;;  %p97_p7 = scmp.lt.s32.totalorder %s479_s12, 3 }
   0xb   : > { %s109_s19 = sshll.u32 %s635_s0, 4  ;;  %s481_s21 = smov [#allocation2]   ;;  %s110_s19 = int_to_ptr.hbm [resolvable:$true] %s109_s19 }
   0xc   : > { %p540_p8 = pnand %p279_p5, %p97_p7  ;;  %s111_s22 = sshll.u32 %s481_s21, 4  ;;  %s112_s22 = int_to_ptr.vmem [resolvable:$true] %s111_s22 }
   0xd   : > { %s550_s23 = sadd.s32 1, %s479_s12   ;;  %s47_s24 = sadd.s32 1, %s475_s11 }
   0xe   : > { %p300_p10 = pneg %p540_p8  ;;  %s44_s25 = ssub.s32 %s479_s12, %s550_s23 }
   0xf   : > { %p45_p12 = scmp.eq.s32.totalorder %s44_s25, 0  ;;  %p54_p13 = scmp.ne.s32.totalorder %s475_s11, %s471_s10 }
  0x10   : > { %p301_p11 = pnand %p300_p10, %p61_p1  ;;  %p55_p0 = scmp.eq.s32.totalorder %s479_s12, 0 }
  0x11   : > { %s559_s26 = scalar_select %p45_p12, %s475_s11, %s47_s24  }
  0x12   : > { %303 = dma.hbm_to_vmem [thread:$0]  (!%p301_p11), %s110_s19, 64, %s112_s22, [#allocation3]  }
  0x13   : > { %p563_p3 = por %p84_p2, %p54_p13  ;;  %p313_p5 = scmp.lt.s32.totalorder %s479_s12, 2 }
  0x14   : > { %s122_s28 = sand.u32 1, %s475_s11   ;;  %s283_s29 = sshll.u32 %s479_s12, 2 }
  0x15   : > { %p56_p7 = por %p55_p0, %p54_p13  ;;  %s282_s30 = sshll.u32 %s122_s28, 2 }
  0x16   : > { %s130_s5 = scalar_lea.hbm %s636_s1, %s283_s29  ;;  %s126_s7 = scalar_lea.vmem [#allocation5], %s282_s30 }
  0x17   : > { %s132_s6 = sshll.u32 %s130_s5, 4  ;;  %s134_s8 = sshll.u32 %s126_s7, 4  ;;  %s133_s6 = int_to_ptr.hbm [resolvable:$true] %s132_s6  ;;  %s135_s8 = int_to_ptr.vmem [resolvable:$true] %s134_s8 }
  0x18   : > { %p573_p10 = pnand %p313_p5, %p56_p7  ;;  %s123_s17 = scalar_lea.sflag [#allocation6], %s122_s28 }
  0x19   : > { %s379_s18 = sshra.s32 %s133_s6, 4  ;;  %s386_s24 = scalar_lea.hbm %s636_s1, 8  ;;  %s380_s18 = int_to_ptr.hbm [resolvable:$true] %s379_s18 }
  0x1a   : > { %s381_s19 = scalar_lea.hbm %s380_s18, 4  ;;  %p383_p11 = pneg %p573_p10 }
  0x1b   : > { %p382_p2 = scmp.ne.s32.totalorder %s380_s18, %s381_s19  ;;  %p387_p0 = scmp.lt.s32.totalorder %s380_s18, %s636_s1 }
  0x1c   : > { %p388_p5 = scmp.lt.s32.totalorder %s386_s24, %s381_s19 }
  0x1d   : > { %p384_p12 = pnand %p383_p11, %p382_p2 }
  0x1e   : > { %p389_p7 = por %p388_p5, %p387_p0 }
  0x1f   : > { %p385_p13 = pneg %p384_p12 }
  0x21   : > { %p390_p9 = pnand %p389_p7, %p385_p13 }
  0x23   : > { %393 = shalt.err (!%p390_p9)
}
  0x24   : > { %307 = dma.hbm_to_vmem [thread:$0]  (!%p573_p10), %s133_s6, 64, %s135_s8, %s123_s17  }
  0x25   : > { %143 = sbr.rel (%p540_p8) target bundleno = 62 (0x3e), region = 28 }
  0x2a   : > { %454 = dma.done.wait (%p61_p1), [#allocation3], 64  }
  0x2b   : > { %456 = vsyncadd (%p61_p1), [#allocation3], 4294967232  ;;  %s594_s28 = sand.u32 1, %s471_s10  }
  0x2c   : > { %s286_s30 = sshll.u32 %s594_s28, 2  ;;  %s151_s3 = scalar_lea.sflag [#allocation6], %s594_s28 }
  0x2d   : > { %s154_s4 = scalar_lea.vmem [#allocation5], %s286_s30 }
  0x2e   : > { %458 = dma.done.wait (%p527_p4), %s151_s3, 64  }
  0x2f   : > { %460 = vsyncadd (%p527_p4), %s151_s3, 4294967232  ;;  %s289_s20 = sshll.u32 %s518_s13, 2  ;;  %s175_s8 = scalar_lea.vmem [#allocation7], %s286_s30  ;;  %v176_v0 = vld [vmem:[%s154_s4] sm:$0xf] }
  0x30   : > { %s191_s7 = scalar_lea.hbm %s637_s2, %s289_s20  ;;  %s193_s14 = sshll.u32 %s175_s8, 4  ;;  %v177_v1 = vld [vmem:[#allocation2] sm:$0xf]  ;;  %s194_s14 = int_to_ptr.vmem [resolvable:$true] %s193_s14 }
  0x31   : > { %s195_s17 = sshll.u32 %s191_s7, 4  ;;  %v178_v2 = vadd.f32 %v177_v1, %v176_v0  ;;  %s181_s18 = scalar_lea.sflag [#allocation4], %s594_s28  ;;  %s196_s17 = int_to_ptr.hbm [resolvable:$true] %s195_s17 }
  0x32   : > { %s423_s15 = sshra.s32 %s196_s17, 4  ;;  %s429_s22 = scalar_lea.hbm %s637_s2, 8  ;;  %s424_s15 = int_to_ptr.hbm [resolvable:$true] %s423_s15 }
  0x33   : > { %179 = vst [vmem:[%s175_s8] sm:$0xf] %v178_v2  ;;  %s425_s19 = scalar_lea.hbm %s424_s15, 4  ;;  %p430_p9 = scmp.lt.s32.totalorder %s424_s15, %s637_s2 }
  0x34   : > { %p426_p1 = scmp.ne.s32.totalorder %s424_s15, %s425_s19  ;;  %p431_p10 = scmp.lt.s32.totalorder %s429_s22, %s425_s19 }
  0x36   : > { %p427_p4 = pnand %p426_p1, %p563_p3  ;;  %p432_p2 = por %p431_p10, %p430_p9 }
  0x38   : > { %p428_p8 = pneg %p427_p4 }
  0x3a   : > { %p433_p11 = pnand %p432_p2, %p428_p8 }
  0x3c   : > { %436 = shalt.err (!%p433_p11)
}
  0x3d   : > { %298 = dma.vmem_to_hbm [thread:$0]  (%p563_p3), %s194_s14, 64, %s196_s17, %s181_s18  }
  0x3e PF: > { %s207_s29 = sand.u32 1, %s467_s9   ;;  %p643_p12 = scmp.ge.s32.totalorder %s479_s12, 2 }
  0x3f   : > { %s208_s28 = scalar_lea.sflag [#allocation4], %s207_s29 }
  0x40   : > { %p309_p13 = pnand %p643_p12, %p532_p6 }
  0x42   : > { %p310_p0 = pneg %p309_p13 }
  0x44   : > { %462 = dma.done.wait (%p310_p0), %s208_s28, 64  }
  0x45   : > { %464 = vsyncadd (%p310_p0), %s208_s28, 4294967232  ;;  %p16_p5 = scmp.ge.s32.totalorder %s550_s23, 4   ;;  %s644_s9 = smov %s471_s10 }
  0x46   : > { %s645_s10 = smov %s475_s11  ;;  %s646_s11 = smov %s559_s26 }
  0x47   : > { %s647_s12 = smov %s550_s23  ;;  %18 = sbr.rel (!%p16_p5) target bundleno = 6 (0x6), region = 78 }
  0x4c   :  { %214 = vsyncpa [#allocation3], 1 }
  0x4d   :  { %216 = vsyncpa [#allocation3 + $0x1], 1 }
  0x4e   :  { %217 = vsyncpa [#allocation6], 1 }
  0x4f   :  { %219 = vsyncpa [#allocation6 + $0x1], 1 }
  0x50   :  { %220 = vsyncpa [#allocation4], 1 }
  0x51   :  { %222 = vsyncpa [#allocation4 + $0x1], 1 }

</bundles_post_ra>
